<compile_context>
chip_gen: v7x
topology: tpu7x:2x2x1
jax: 0.10.0
libtpu: 0.0.40
codegen_flags: <defaults>
</compile_context>

<pallas_src>
import math

import jax
import jax.numpy as jnp
from jax import lax
from jax.experimental import pallas as pl
from jax.experimental.pallas import tpu as pltpu


# Static problem sizes.
B, S, H = 2, 32, 96
DQ, DK, DV = 96, 96, 32            # DV must equal S for v @ p^T
LANE = 128
W_COLS = 3 * LANE                  # lane-aligned fused QKV width (q|k|v at 0/128/256)
_SCALE = 1.0 / math.sqrt(S)        # torch: 1/sqrt(scores.shape[-1]) == 1/sqrt(S)
_DN = (((1,), (1,)), ((), ()))     # contract last axis of both operands (A @ B^T)


def _attn_kernel(x_ref, w_ref, o_ref):
    # Single invocation: whole activation and fused weight resident in VMEM.
    x = x_ref[...]                                               # (B*S, H)
    w = w_ref[...]                                               # (H, 384)

    # One fused, lane-dense QKV projection matmul.
    qkv = jnp.dot(x, w, preferred_element_type=jnp.float32)      # (B*S, 384)

    # B == 2: unroll per-batch attention statically.
    for b in range(B):
        rows = slice(b * S, (b + 1) * S)
        # Lane-tile aligned slices (starts at lanes 0 / 128 / 256).  q/k keep
        # their 32 zero columns: they add nothing to the contraction.
        qb = qkv[rows, 0:LANE]                                   # (S, 128)
        kb = qkv[rows, LANE:2 * LANE]                            # (S, 128)
        vb = qkv[rows, 2 * LANE:2 * LANE + DV]                   # (S, DV)

        # scores = q @ k^T as a contraction of the last axes (no explicit .T).
        s = lax.dot_general(qb, kb, _DN,
                            preferred_element_type=jnp.float32)  # (S, S)
        s = s * _SCALE

        # softmax over last axis (all f32); EUP approx reciprocal for the norm.
        m = jnp.max(s, axis=-1, keepdims=True)
        e = jnp.exp(s - m)
        denom = jnp.sum(e, axis=-1, keepdims=True)
        p = e * pl.reciprocal(denom, approx=True)                # (S, S)

        # out = v @ p^T, stored straight into the unpadded (S, S) output slab.
        out_b = lax.dot_general(vb, p, _DN,
                                preferred_element_type=jnp.float32)  # (S, S)
        o_ref[b] = out_b.astype(o_ref.dtype)


def prepare_qkv_weight(wq, wk, wv):
    """One-time (init-time) weight prep: fuse + pad so each group starts on a
    128-lane boundary.  wq/wk/wv are (in, out) = W^T of the torch Linears."""
    w = jnp.zeros((H, W_COLS), dtype=jnp.float32)
    w = w.at[:, 0:wq.shape[1]].set(wq)
    w = w.at[:, LANE:LANE + wk.shape[1]].set(wk)
    w = w.at[:, 2 * LANE:2 * LANE + wv.shape[1]].set(wv)
    return w


def attention_model(x, w_qkv):
    """x: (B, S, H); w_qkv: (H, 384) prepared fused weight. Returns (B, S, S)."""
    assert x.shape == (B, S, H)
    assert w_qkv.shape == (H, W_COLS)
    x2d = x.reshape(B * S, H)

    flops = (2 * B * S * H * W_COLS        # fused projection
             + 2 * B * S * S * LANE        # q @ k^T (padded contraction)
             + 2 * B * S * S * DV)         # v @ p^T
    bytes_accessed = 4 * (B * S * H + H * W_COLS + B * S * S)
    cost = pl.CostEstimate(flops=flops,
                           transcendentals=B * S * S,
                           bytes_accessed=bytes_accessed)

    return pl.pallas_call(
        _attn_kernel,
        out_shape=jax.ShapeDtypeStruct((B, S, S), x.dtype),
        in_specs=[
            pl.BlockSpec((B * S, H), lambda: (0, 0)),            # x (flattened)
            pl.BlockSpec((H, W_COLS), lambda: (0, 0)),           # fused W_qkv
        ],
        out_specs=pl.BlockSpec((B, S, S), lambda: (0, 0, 0)),
        compiler_params=pltpu.CompilerParams(
            vmem_limit_bytes=8 * 1024 * 1024,
        ),
        cost_estimate=cost,
    )(x2d, w_qkv)


def reference(x, wq, wk, wv):
    q = x @ wq
    k = x @ wk
    v = x @ wv
    s = jnp.einsum("bsd,btd->bst", q, k)                         # q @ k^T
    s = s * (1.0 / math.sqrt(s.shape[-1]))
    p = jax.nn.softmax(s, axis=-1)
    return jnp.einsum("bsk,btk->bst", v, p)                      # v @ p^T


if __name__ == "__main__":
    key = jax.random.PRNGKey(0)
    kx, kq, kk, kv = jax.random.split(key, 4)

    x = jax.random.normal(kx, (B, S, H), dtype=jnp.float32)
    # Deterministic Linear(bias=False) weights, stored as (in, out) = W^T.
    wq = jax.random.normal(kq, (H, DQ), dtype=jnp.float32) * (1.0 / math.sqrt(H))
    wk = jax.random.normal(kk, (H, DK), dtype=jnp.float32) * (1.0 / math.sqrt(H))
    wv = jax.random.normal(kv, (H, DV), dtype=jnp.float32) * (1.0 / math.sqrt(H))

    # One-time weight preparation (== torch module init), off the hot path.
    w_qkv = jax.block_until_ready(prepare_qkv_weight(wq, wk, wv))

    out = attention_model(x, w_qkv)
    out = jax.block_until_ready(out)

    ref = reference(x, wq, wk, wv)
    assert out.shape == (B, S, S)
    max_err = float(jnp.max(jnp.abs(out - ref)))
    assert jnp.allclose(out, ref, atol=2e-3, rtol=2e-3), max_err

    print("KERNEL_OK")
</pallas_src>

<mosaic_0001>
module attributes {stable_mosaic.version = 11 : i64} {
  func.func @_attn_kernel(%arg0: memref<64x96xf32, #tpu.memory_space<vmem>>, %arg1: memref<96x384xf32, #tpu.memory_space<vmem>>, %arg2: memref<2x32x32xf32, #tpu.memory_space<vmem>>) attributes {dimension_semantics = [], scalar_prefetch = 0 : i64, scratch_operands = 0 : i64, tpu.core_type = #tpu.core_type<tc>} {
    %c0 = arith.constant 0 : index
    %c0_0 = arith.constant 0 : index
    %0 = vector.load %arg0[%c0, %c0_0] : memref<64x96xf32, #tpu.memory_space<vmem>>, vector<64x96xf32>
    %c0_1 = arith.constant 0 : index
    %c0_2 = arith.constant 0 : index
    %1 = vector.load %arg1[%c0_1, %c0_2] : memref<96x384xf32, #tpu.memory_space<vmem>>, vector<96x384xf32>
    %cst = arith.constant dense<0.000000e+00> : vector<64x384xf32>
    %2 = tpu.matmul %0, %1, %cst {dimension_numbers = #tpu.dot_dimension_numbers<[1], [0], [0], [1], [0, 0, 1, 1], [], []>} : vector<64x96xf32>, vector<96x384xf32>, vector<64x384xf32> -> vector<64x384xf32>
    %3 = vector.extract_strided_slice %2 {offsets = [0, 0], sizes = [32, 128], strides = [1, 1]} : vector<64x384xf32> to vector<32x128xf32>
    %4 = vector.extract_strided_slice %2 {offsets = [0, 128], sizes = [32, 128], strides = [1, 1]} : vector<64x384xf32> to vector<32x128xf32>
    %5 = vector.extract_strided_slice %2 {offsets = [0, 256], sizes = [32, 32], strides = [1, 1]} : vector<64x384xf32> to vector<32x32xf32>
    %cst_3 = arith.constant dense<0.000000e+00> : vector<32x32xf32>
    %6 = tpu.matmul %3, %4, %cst_3 {dimension_numbers = #tpu.dot_dimension_numbers<[1], [1], [0], [0], [0, 0, 1, 0], [], []>} : vector<32x128xf32>, vector<32x128xf32>, vector<32x32xf32> -> vector<32x32xf32>
    %cst_4 = arith.constant 0.176776692 : f32
    %7 = vector.broadcast %cst_4 : f32 to vector<32x32xf32>
    %8 = arith.mulf %6, %7 : vector<32x32xf32>
    %cst_5 = arith.constant dense<0xFF800000> : vector<32xf32>
    %9 = vector.multi_reduction <maximumf>, %8, %cst_5 [1] : vector<32x32xf32> to vector<32xf32>
    %10 = vector.shape_cast %9 : vector<32xf32> to vector<32x1xf32>
    %11 = vector.broadcast %10 : vector<32x1xf32> to vector<32x32xf32>
    %12 = arith.subf %8, %11 : vector<32x32xf32>
    %13 = math.exp %12 : vector<32x32xf32>
    %cst_6 = arith.constant dense<0.000000e+00> : vector<32xf32>
    %14 = vector.multi_reduction <add>, %13, %cst_6 [1] : vector<32x32xf32> to vector<32xf32>
    %15 = vector.shape_cast %14 : vector<32xf32> to vector<32x1xf32>
    %16 = tpu.reciprocal %15 {approx = true} : vector<32x1xf32> -> vector<32x1xf32>
    %17 = vector.broadcast %16 : vector<32x1xf32> to vector<32x32xf32>
    %18 = arith.mulf %13, %17 : vector<32x32xf32>
    %cst_7 = arith.constant dense<0.000000e+00> : vector<32x32xf32>
    %19 = tpu.matmul %5, %18, %cst_7 {dimension_numbers = #tpu.dot_dimension_numbers<[1], [1], [0], [0], [0, 0, 1, 0], [], []>} : vector<32x32xf32>, vector<32x32xf32>, vector<32x32xf32> -> vector<32x32xf32>
    %c0_8 = arith.constant 0 : index
    %c0_9 = arith.constant 0 : index
    %c0_10 = arith.constant 0 : index
    %20 = vector.load %arg2[%c0_8, %c0_9, %c0_10] : memref<2x32x32xf32, #tpu.memory_space<vmem>>, vector<1x32x32xf32>
    %21 = vector.shape_cast %20 : vector<1x32x32xf32> to vector<32x32xf32>
    %22 = vector.shape_cast %19 : vector<32x32xf32> to vector<1x32x32xf32>
    tpu.vector_store %arg2[%c0_8, %c0_9, %c0_10], %22 {strides = array<i32>} : memref<2x32x32xf32, #tpu.memory_space<vmem>>, vector<1x32x32xf32>,
    %23 = vector.extract_strided_slice %2 {offsets = [32, 0], sizes = [32, 128], strides = [1, 1]} : vector<64x384xf32> to vector<32x128xf32>
    %24 = vector.extract_strided_slice %2 {offsets = [32, 128], sizes = [32, 128], strides = [1, 1]} : vector<64x384xf32> to vector<32x128xf32>
    %25 = vector.extract_strided_slice %2 {offsets = [32, 256], sizes = [32, 32], strides = [1, 1]} : vector<64x384xf32> to vector<32x32xf32>
    %cst_11 = arith.constant dense<0.000000e+00> : vector<32x32xf32>
    %26 = tpu.matmul %23, %24, %cst_11 {dimension_numbers = #tpu.dot_dimension_numbers<[1], [1], [0], [0], [0, 0, 1, 0], [], []>} : vector<32x128xf32>, vector<32x128xf32>, vector<32x32xf32> -> vector<32x32xf32>
    %cst_12 = arith.constant 0.176776692 : f32
    %27 = vector.broadcast %cst_12 : f32 to vector<32x32xf32>
    %28 = arith.mulf %26, %27 : vector<32x32xf32>
    %cst_13 = arith.constant dense<0xFF800000> : vector<32xf32>
    %29 = vector.multi_reduction <maximumf>, %28, %cst_13 [1] : vector<32x32xf32> to vector<32xf32>
    %30 = vector.shape_cast %29 : vector<32xf32> to vector<32x1xf32>
    %31 = vector.broadcast %30 : vector<32x1xf32> to vector<32x32xf32>
    %32 = arith.subf %28, %31 : vector<32x32xf32>
    %33 = math.exp %32 : vector<32x32xf32>
    %cst_14 = arith.constant dense<0.000000e+00> : vector<32xf32>
    %34 = vector.multi_reduction <add>, %33, %cst_14 [1] : vector<32x32xf32> to vector<32xf32>
    %35 = vector.shape_cast %34 : vector<32xf32> to vector<32x1xf32>
    %36 = tpu.reciprocal %35 {approx = true} : vector<32x1xf32> -> vector<32x1xf32>
    %37 = vector.broadcast %36 : vector<32x1xf32> to vector<32x32xf32>
    %38 = arith.mulf %33, %37 : vector<32x32xf32>
    %cst_15 = arith.constant dense<0.000000e+00> : vector<32x32xf32>
    %39 = tpu.matmul %25, %38, %cst_15 {dimension_numbers = #tpu.dot_dimension_numbers<[1], [1], [0], [0], [0, 0, 1, 0], [], []>} : vector<32x32xf32>, vector<32x32xf32>, vector<32x32xf32> -> vector<32x32xf32>
    %c1 = arith.constant 1 : index
    %c0_16 = arith.constant 0 : index
    %c0_17 = arith.constant 0 : index
    %40 = vector.load %arg2[%c1, %c0_16, %c0_17] : memref<2x32x32xf32, #tpu.memory_space<vmem>>, vector<1x32x32xf32>
    %41 = vector.shape_cast %40 : vector<1x32x32xf32> to vector<32x32xf32>
    %42 = vector.shape_cast %39 : vector<32x32xf32> to vector<1x32x32xf32>
    tpu.vector_store %arg2[%c1, %c0_16, %c0_17], %42 {strides = array<i32>} : memref<2x32x32xf32, #tpu.memory_space<vmem>>, vector<1x32x32xf32>,
    return
  }
}

</mosaic_0001>

<bundles_post_ra>
// kernel: tpu_custom_call.1
= control target key start
LH: loop header
LB: loop body
LE: loop exit
PB: predicated region body
PF: predicated region fallthrough
CT: control target
= control target key end

     0   :  { %7 = vsyncpa [#allocation3], 0  ;;  %s1388_s0 = inlined_call_operand.hbm [shape: f32[64,96], index: 0, kind: input, shape index: {}]   ;;  %s1389_s1 = inlined_call_operand.hbm [shape: f32[96,384], index: 1, kind: input, shape index: {}]   ;;  %s1390_s2 = inlined_call_operand.hbm [shape: f32[2,32,32], index: 2, kind: output, shape index: {}]  }
   0x1   :  { %8 = vsyncpa [#allocation6], 0 }
   0x2   :  { %9 = vsyncpa [#allocation4], 0  ;;  %s1219_s9 = smov [#allocation2]   ;;  %s1147_s13 = scalar_lea.hbm %s1388_s0, 1024 }
   0x3   :  { %s15_s10 = sshll.u32 %s1219_s9, 4  ;;  %p1148_p0 = scmp.ne.s32.totalorder %s1388_s0, %s1147_s13  ;;  %s16_s10 = int_to_ptr.vmem [resolvable:$true] %s15_s10 }
   0x4   :  { %p1151_p1 = scmp.lt.u32.totalorder %s1147_s13, %s1388_s0 }
   0x6   :  { %p1153_p2 = pnand %p1151_p1, %p1148_p0 }
   0x8   :  { %1156 = shalt.err (!%p1153_p2)
}
   0x9   :  { %s1157_s18 = scalar_lea.vmem %s16_s10, 1024  ;;  %p1162_p4 = scmp.lt.s32.totalorder %s16_s10, %s16_s10 }
   0xa   :  { %p1158_p3 = scmp.ne.s32.totalorder %s16_s10, %s1157_s18  ;;  %p1163_p5 = scmp.lt.s32.totalorder %s1157_s18, %s1157_s18 }
   0xc   :  { %p1164_p6 = por %p1163_p5, %p1162_p4 }
   0xe   :  { %p1165_p7 = pnand %p1164_p6, %p1158_p3 }
  0x10   :  { %1168 = shalt.err (!%p1165_p7)
}
  0x11   :  { %s1220_s19 = smov 128   ;;  %s1221_s20 = smov 8  }
  0x12   :  { %21 = dma.hbm_to_vmem [thread:$0]  %s1388_s0, 1024, %s16_s10, [#allocation3], %s1220_s19, %s1220_s19, %s1221_s20  }
  0x13   :  { %s1222_s23 = smov [#allocation5]   ;;  %s1169_s27 = scalar_lea.hbm %s1389_s1, 4608 }
  0x14   :  { %s27_s24 = sshll.u32 %s1222_s23, 4  ;;  %p1170_p8 = scmp.ne.s32.totalorder %s1389_s1, %s1169_s27  ;;  %s28_s24 = int_to_ptr.vmem [resolvable:$true] %s27_s24 }
  0x15   :  { %p1173_p9 = scmp.lt.u32.totalorder %s1169_s27, %s1389_s1 }
  0x17   :  { %p1175_p10 = pnand %p1173_p9, %p1170_p8 }
  0x19   :  { %1178 = shalt.err (!%p1175_p10)
}
  0x1a   :  { %s1179_s4 = scalar_lea.vmem %s28_s24, 4608  ;;  %p1184_p12 = scmp.lt.s32.totalorder %s28_s24, %s28_s24 }
  0x1b   :  { %p1180_p11 = scmp.ne.s32.totalorder %s28_s24, %s1179_s4  ;;  %p1185_p13 = scmp.lt.s32.totalorder %s1179_s4, %s1179_s4 }
  0x1d   :  { %p1186_p0 = por %p1185_p13, %p1184_p12 }
  0x1f   :  { %p1187_p1 = pnand %p1186_p0, %p1180_p11 }
  0x21   :  { %1190 = shalt.err (!%p1187_p1)
}
  0x22   :  { %s1223_s0 = smov 384   ;;  %s1224_s5 = smov 24  }
  0x23   :  { %33 = dma.hbm_to_vmem [thread:$0]  %s1389_s1, 4608, %s28_s24, [#allocation6], %s1223_s0, %s1223_s0, %s1224_s5  }
  0x24   :  { %1213 = dma.done.wait [#allocation3], 1024  }
  0x25   :  { %1214 = vsyncadd [#allocation3], 4294966272 }
  0x26   :  { %1215 = dma.done.wait [#allocation6], 4608  }
  0x27   :  { %1216 = vsyncadd [#allocation6], 4294962688  ;;  %v1225_v0 = vmov 0.0   ;;  %v49_v1 = vld [vmem:[#allocation5 + $0x8] sm:$0xff]  ;;  %v52_v2 = vld [vmem:[#allocation5 + $0x20] sm:$0xff]  ;;  %vm84_vm0 = vcmask 785408  }
  0x28   :  { %173 = vmatprep.mubr.f32.mxu0 %v1225_v0  ;;  %v48_v3 = vld [vmem:[#allocation5] sm:$0xff]  ;;  %v1015_v4 = vpack.c.bf16 %v52_v2, %v49_v1  ;;  %v51_v5 = vld [vmem:[#allocation5 + $0x18] sm:$0xff]  ;;  %v58_v7 = vld [vmem:[#allocation5 + $0x50] sm:$0xff]  ;;  %vm416_vm1 = vcmask 261120   ;;  %s1226_s1 = smov [#allocation7]  }
  0x29   :  { %v55_v6 = vld [vmem:[#allocation5 + $0x38] sm:$0xff]  ;;  %v1017_v8 = vpack.c.bf16 %v51_v5, %v48_v3  ;;  %v54_v10 = vld [vmem:[#allocation5 + $0x30] sm:$0xff]  ;;  %v57_v11 = vld [vmem:[#allocation5 + $0x48] sm:$0xff]  ;;  %s826_s8 = sshll.u32 %s1226_s1, 4  ;;  %s827_s8 = int_to_ptr.vmem [resolvable:$true] %s826_s8 }
  0x2a   :  { %v1019_v9 = vpack.c.bf16 %v58_v7, %v55_v6  ;;  %v61_v12 = vld [vmem:[#allocation5 + $0x68] sm:$0xff]  ;;  %1016 = vmatprep.subr.bf16.mxu0 %v1015_v4  ;;  %v64_v13 = vld [vmem:[#allocation5 + $0x80] sm:$0xff]  ;;  %v1021_v14 = vpack.c.bf16 %v57_v11, %v54_v10  ;;  %v63_v17 = vld [vmem:[#allocation5 + $0x78] sm:$0xff]  ;;  %s1191_s9 = scalar_lea.vmem %s827_s8, 1024  ;;  %p1196_p3 = scmp.lt.s32.totalorder %s827_s8, %s827_s8 }
  0x2b   :  { %1018 = vmatpush1.bf16.msra.mxu0 %v1017_v8  ;;  %v1023_v15 = vpack.c.bf16 %v64_v13, %v61_v12  ;;  %v60_v16 = vld [vmem:[#allocation5 + $0x60] sm:$0xff]  ;;  %v67_v18 = vld [vmem:[#allocation5 + $0x98] sm:$0xff]  ;;  %v70_v19 = vld [vmem:[#allocation5 + $0xb0] sm:$0xff]  ;;  %p1192_p2 = scmp.ne.s32.totalorder %s827_s8, %s1191_s9  ;;  %p1197_p4 = scmp.lt.s32.totalorder %s1191_s9, %s1191_s9 }
  0x2c   :  { %1020 = vmatprep.subr.bf16.mxu0 %v1019_v9  ;;  %v1025_v20 = vpack.c.bf16 %v63_v17, %v60_v16  ;;  %v40_v21 = vld [vmem:[#allocation2] sm:$0xff]  ;;  %v1027_v22 = vpack.c.bf16 %v70_v19, %v67_v18  ;;  %v66_v23 = vld [vmem:[#allocation5 + $0x90] sm:$0xff]  ;;  %v69_v24 = vld [vmem:[#allocation5 + $0xa8] sm:$0xff] }
  0x2d   :  { %947 = vmatprep.mubr.msk.f32.mxu1 %vm84_vm0, %v40_v21  ;;  %v73_v25 = vld [vmem:[#allocation5 + $0xc8] sm:$0xff]  ;;  %v76_v26 = vld [vmem:[#allocation5 + $0xe0] sm:$0xff]  ;;  %v50_v27 = vld [vmem:[#allocation5 + $0x10] sm:$0xff]  ;;  %v1029_v31 = vpack.c.bf16 %v69_v24, %v66_v23  ;;  %p1198_p5 = por %p1197_p4, %p1196_p3 }
  0x2e   :  { %v53_v28 = vld [vmem:[#allocation5 + $0x28] sm:$0xff]  ;;  %v56_v29 = vld [vmem:[#allocation5 + $0x40] sm:$0xff]  ;;  %v59_v30 = vld [vmem:[#allocation5 + $0x58] sm:$0xff]  ;;  %v1031_v35 = vpack.c.bf16 %v76_v26, %v73_v25 }
  0x2f   :  { %1022 = vmatpush1.bf16.msra.mxu0 %v1021_v14  ;;  %v72_v32 = vld [vmem:[#allocation5 + $0xc0] sm:$0xff]  ;;  %v1039_v33 = vpack.c.bf16 %v53_v28, %v50_v27  ;;  %v1043_v34 = vpack.c.bf16 %v59_v30, %v56_v29  ;;  %v75_v36 = vld [vmem:[#allocation5 + $0xd8] sm:$0xff]  ;;  %v62_v37 = vld [vmem:[#allocation5 + $0x70] sm:$0xff]  ;;  %p1199_p6 = pnand %p1198_p5, %p1192_p2 }
  0x30   :  { %1024 = vmatprep.subr.bf16.mxu0 %v1023_v15  ;;  %v65_v38 = vld [vmem:[#allocation5 + $0x88] sm:$0xff]  ;;  %v79_v39 = vld [vmem:[#allocation5 + $0xf8] sm:$0xff]  ;;  %v82_v40 = vld [vmem:[#allocation5 + $0x110] sm:$0xff]  ;;  %v1033_v41 = vpack.c.bf16 %v75_v36, %v72_v32 }
  0x31   :  { %1040 = vmatprep.subr.bf16.mxu1 %v1039_v33  ;;  %v78_v42 = vld [vmem:[#allocation5 + $0xf0] sm:$0xff]  ;;  %v1047_v43 = vpack.c.bf16 %v65_v38, %v62_v37  ;;  %v1035_v44 = vpack.c.bf16 %v82_v40, %v79_v39  ;;  %v81_v45 = vld [vmem:[#allocation5 + $0x108] sm:$0xff]  ;;  %v68_v46 = vld [vmem:[#allocation5 + $0xa0] sm:$0xff] }
  0x32   :  { %1042 = vmatpush3.bf16.msra.mxu1 %v1039_v33  ;;  %v71_v47 = vld [vmem:[#allocation5 + $0xb8] sm:$0xff]  ;;  %v1037_v48 = vpack.c.bf16 %v81_v45, %v78_v42  ;;  %v74_v50 = vld [vmem:[#allocation5 + $0xd0] sm:$0xff]  ;;  %v77_v51 = vld [vmem:[#allocation5 + $0xe8] sm:$0xff] }
  0x33   :  { %1026 = vmatpush1.bf16.msra.mxu0 %v1025_v20  ;;  %1044 = vmatprep.subr.bf16.mxu1 %v1043_v34  ;;  %v1051_v49 = vpack.c.bf16 %v71_v47, %v68_v46  ;;  %v1055_v52 = vpack.c.bf16 %v77_v51, %v74_v50  ;;  %v80_v53 = vld [vmem:[#allocation5 + $0x100] sm:$0xff]  ;;  %v83_v54 = vld [vmem:[#allocation5 + $0x118] sm:$0xff]  ;;  %v41_v55 = vld [vmem:[#allocation2 + $0x8] sm:$0xff] }
  0x34   :  { %1028 = vmatprep.subr.bf16.mxu0 %v1027_v22  ;;  %v1059_v56 = vpack.c.bf16 %v83_v54, %v80_v53  ;;  %v42_v57 = vld [vmem:[#allocation2 + $0x10] sm:$0xff]  ;;  %v43_v58 = vld [vmem:[#allocation2 + $0x18] sm:$0xff]  ;;  %v44_v59 = vld [vmem:[#allocation2 + $0x20] sm:$0xff] }
  0x35   :  { %v45_v60 = vld [vmem:[#allocation2 + $0x28] sm:$0xff]  ;;  %v46_v61 = vld [vmem:[#allocation2 + $0x30] sm:$0xff]  ;;  %v47_v62 = vld [vmem:[#allocation2 + $0x38] sm:$0xff] }
  0x36   :  { %1046 = vmatpush3.bf16.msra.mxu1 %v1043_v34  ;;  %vm1325_vm2 = vmpackc.low %vm416_vm1, %vm416_vm1 }
  0x37   :  { %1030 = vmatpush1.bf16.msra.mxu0 %v1029_v31  ;;  %1048 = vmatprep.subr.bf16.mxu1 %v1047_v43 }
  0x38   :  { %1032 = vmatprep.subr.bf16.mxu0 %v1031_v35 }
  0x3a   :  { %1050 = vmatpush3.bf16.msra.mxu1 %v1047_v43 }
  0x3b   :  { %1034 = vmatpush1.bf16.msra.mxu0 %v1033_v41  ;;  %1052 = vmatprep.subr.bf16.mxu1 %v1051_v49 }
  0x3c   :  { %1036 = vmatprep.subr.bf16.mxu0 %v1035_v44 }
  0x3e   :  { %1054 = vmatpush3.bf16.msra.mxu1 %v1051_v49 }
  0x3f   :  { %1038 = vmatpush1.bf16.msra.mxu0 %v1037_v48  ;;  %1056 = vmatprep.subr.bf16.mxu1 %v1055_v52 }
  0x42   :  { %839 = vmatmul.mubr.msk.f32.vlgmr.msra.gmra.mrb[0].mxu0 %vm84_vm0, %v40_v21  ;;  %1058 = vmatpush3.bf16.msra.mxu1 %v1055_v52 }
  0x43   :  { %179 = vmatprep.mubr.f32.mxu0 %v1225_v0  ;;  %1060 = vmatprep.subr.bf16.mxu1 %v1059_v56 }
  0x46   :  { %840 = vmatmul.mubr.msk.f32.gmra.mrb[2].mxu0 %vm84_vm0, %v41_v55  ;;  %1062 = vmatpush3.bf16.msra.mxu1 %v1059_v56 }
  0x47   :  { %185 = vmatprep.mubr.f32.mxu0 %v1225_v0 }
  0x49   :  { %948 = vmatmul.mubr.msk.f32.vlgmr.msra.gmra.mrb[0].mxu1 %vm84_vm0, %v41_v55 }
  0x4a   :  { %841 = vmatmul.mubr.msk.f32.gmra.mrb[4].mxu0 %vm84_vm0, %v42_v57  ;;  %950 = vmatprep.mubr.msk.f32.mxu1 %vm84_vm0, %v42_v57 }
  0x4b   :  { %191 = vmatprep.mubr.f32.mxu0 %v1225_v0 }
  0x4d   :  { %951 = vmatmul.mubr.msk.f32.gmra.mrb[2].mxu1 %vm84_vm0, %v43_v58 }
  0x4e   :  { %842 = vmatmul.mubr.msk.f32.gmra.mrb[6].mxu0 %vm84_vm0, %v43_v58  ;;  %953 = vmatprep.mubr.msk.f32.mxu1 %vm84_vm0, %v44_v59 }
  0x4f   :  { %197 = vmatprep.mubr.f32.mxu0 %v1225_v0 }
  0x51   :  { %954 = vmatmul.mubr.msk.f32.gmra.mrb[4].mxu1 %vm84_vm0, %v45_v60 }
  0x52   :  { %843 = vmatmul.mubr.msk.f32.gmra.mrb[8].mxu0 %vm84_vm0, %v44_v59  ;;  %956 = vmatprep.mubr.msk.f32.mxu1 %vm84_vm0, %v46_v61 }
  0x53   :  { %203 = vmatprep.mubr.f32.mxu0 %v1225_v0 }
  0x55   :  { %957 = vmatmul.mubr.msk.f32.gmra.mrb[6].mxu1 %vm84_vm0, %v47_v62 }
  0x56   :  { %844 = vmatmul.mubr.msk.f32.gmra.mrb[10].mxu0 %vm84_vm0, %v45_v60 }
  0x57   :  { %209 = vmatprep.mubr.f32.mxu0 %v1225_v0 }
  0x5a   :  { %845 = vmatmul.mubr.msk.f32.gmra.mrb[12].mxu0 %vm84_vm0, %v46_v61 }
  0x5b   :  { %215 = vmatprep.mubr.f32.mxu0 %v1225_v0 }
  0x5e   :  { %846 = vmatmul.mubr.msk.f32.gmra.mrb[14].mxu0 %vm84_vm0, %v47_v62 }
 0x115   :  { %v175_v63 = vpop.f32.mrb[0].mxu0 }
 0x116   :  { %v177_v1 = vpop.f32.mrb[1].mxu0  ;;  %967 = vmatprep.mubr.f32.mxu1 %v175_v63 }
 0x119   :  { %v181_v2 = vpop.f32.mrb[2].mxu0 }
 0x11a   :  { %v183_v3 = vpop.f32.mrb[3].mxu0 }
 0x11b   :  { %v1063_v4 = vpack.c.bf16 %v183_v3, %v177_v1 }
 0x11c   :  { %v1293_v7 = vpop.f32.mrb[0].mxu1 }
 0x11d   :  { %v187_v5 = vpop.f32.mrb[4].mxu0  ;;  %1064 = vmatprep.subr.bf16.mxu1 %v1063_v4  ;;  %v288_v9 = vpop.f32.mrb[1].mxu1 }
 0x11e   :  { %v189_v6 = vpop.f32.mrb[5].mxu0  ;;  %1066 = vmatpush3.bf16.xpose.msra.mxu1 %v1063_v4  ;;  %981 = vmatprep.mubr.msk.f32.mxu0 %vm416_vm1, %v288_v9 }
 0x120   :  { %v1296_v11 = vpop.f32.mrb[2].mxu1 }
 0x121   :  { %v193_v8 = vpop.f32.mrb[6].mxu0  ;;  %v1298_v13 = vpop.f32.mrb[3].mxu1 }
 0x122   :  { %v195_v10 = vpop.f32.mrb[7].mxu0 }
 0x123   :  { %v1067_v0 = vpack.c.bf16 %v195_v10, %v189_v6 }
 0x124   :  { %v1300_v15 = vpop.f32.mrb[4].mxu1 }
 0x125   :  { %1068 = vmatprep.subr.bf16.mxu1 %v1067_v0  ;;  %v199_v12 = vpop.f32.mrb[8].mxu0  ;;  %v1302_v17 = vpop.f32.mrb[5].mxu1 }
 0x126   :  { %1070 = vmatpush3.bf16.xpose.msra.mxu1 %v1067_v0  ;;  %v201_v14 = vpop.f32.mrb[9].mxu0 }
 0x128   :  { %v1304_v20 = vpop.f32.mrb[6].mxu1 }
 0x129   :  { %v205_v16 = vpop.f32.mrb[10].mxu0  ;;  %v318_v22 = vpop.f32.mrb[7].mxu1 }
 0x12a   :  { %v207_v18 = vpop.f32.mrb[11].mxu0 }
 0x12b   :  { %v1083_v19 = vpack.c.bf16 %v207_v18, %v201_v14 }
 0x12d   :  { %968 = vmatmul.mubr.f32.vlgmr.msra.gmra.mrb[8].mxu1 %v181_v2  ;;  %1084 = vmatprep.subr.bf16.mxu1 %v1083_v19  ;;  %v211_v21 = vpop.f32.mrb[12].mxu0 }
 0x12e   :  { %970 = vmatprep.mubr.f32.mxu1 %v187_v5  ;;  %1086 = vmatpush3.bf16.xpose.msra.mxu1 %v1083_v19  ;;  %v213_v23 = vpop.f32.mrb[13].mxu0 }
 0x131   :  { %v217_v24 = vpop.f32.mrb[14].mxu0  ;;  %971 = vmatmul.mubr.f32.gmra.mrb[10].mxu1 %v193_v8 }
 0x132   :  { %v219_v25 = vpop.f32.mrb[15].mxu0  ;;  %995 = vmatprep.mubr.f32.mxu1 %v199_v12 }
 0x133   :  { %v1087_v26 = vpack.c.bf16 %v219_v25, %v213_v23 }
 0x135   :  { %1088 = vmatprep.subr.bf16.mxu1 %v1087_v26 }
 0x136   :  { %1090 = vmatpush3.bf16.xpose.msra.mxu1 %v1087_v26 }
 0x13d   :  { %996 = vmatmul.mubr.f32.vlgmr.msra.gmra.mrb[12].mxu1 %v205_v16 }
 0x13e   :  { %998 = vmatprep.mubr.f32.mxu1 %v211_v21 }
 0x141   :  { %999 = vmatmul.mubr.f32.gmra.mrb[14].mxu1 %v217_v24 }
 0x142   :  { %1012 = vmatprep.mubr.msk.f32.mxu1 %vm416_vm1, %v318_v22 }
 0x200   :  { %v969_v27 = vpop.f32.mrb[8].mxu1 }
 0x201   :  { %v393_v28 = vpop.f32.mrb[9].mxu1  ;;  %v413_v30 = vmul.f32 0.17677669, %v969_v27 }
 0x202   :  { %v412_v29 = vmul.f32 0.17677669, %v393_v28 }
 0x203   :  { %v420_v36 = vsel %vm416_vm1, %v413_v30, -inf }
 0x204   :  { %v972_v31 = vpop.f32.mrb[10].mxu1  ;;  %v417_v32 = vsel %vm416_vm1, %v412_v29, -inf }
 0x205   :  { %418 = vmax.xlane.f32.xlu0 %v417_v32  ;;  %v403_v33 = vpop.f32.mrb[11].mxu1  ;;  %v415_v35 = vmul.f32 0.17677669, %v972_v31 }
 0x206   :  { %v414_v34 = vmul.f32 0.17677669, %v403_v33 }
 0x207   :  { %v426_v38 = vsel %vm416_vm1, %v415_v35, -inf }
 0x208   :  { %v423_v37 = vsel %vm416_vm1, %v414_v34, -inf }
 0x209   :  { %421 = vmax.xlane.f32.xlu0 %v420_v36  ;;  %424 = vmax.xlane.f32.xlu1 %v423_v37 }
 0x20d   :  { %427 = vmax.xlane.f32.xlu1 %v426_v38 }
 0x210   :  { %v997_v39 = vpop.f32.mrb[12].mxu1 }
 0x211   :  { %v660_v40 = vmul.f32 0.17677669, %v997_v39  ;;  %v640_v41 = vpop.f32.mrb[13].mxu1 }
 0x212   :  { %v659_v42 = vmul.f32 0.17677669, %v640_v41 }
 0x213   :  { %v666_v43 = vsel %vm416_vm1, %v660_v40, -inf }
 0x214   :  { %667 = vmax.xlane.f32.xlu1 %v666_v43  ;;  %v1000_v44 = vpop.f32.mrb[14].mxu1  ;;  %v663_v45 = vsel %vm416_vm1, %v659_v42, -inf }
 0x215   :  { %v662_v46 = vmul.f32 0.17677669, %v1000_v44  ;;  %664 = vmax.xlane.f32.xlu0 %v663_v45  ;;  %v650_v47 = vpop.f32.mrb[15].mxu1 }
 0x216   :  { %v661_v48 = vmul.f32 0.17677669, %v650_v47 }
 0x217   :  { %v672_v49 = vsel %vm416_vm1, %v662_v46, -inf }
 0x218   :  { %673 = vmax.xlane.f32.xlu1 %v672_v49  ;;  %v669_v50 = vsel %vm416_vm1, %v661_v48, -inf }
 0x219   :  { %670 = vmax.xlane.f32.xlu0 %v669_v50 }
 0x292   :  { %v419_v51 = vpop.xlane.xlu0 %418 }
 0x293   :  { %v429_v52 = vsub.f32 %v412_v29, %v419_v51 }
 0x295   :  { %v433_v53 = vmul.f32 1.442695, %v429_v52 }
 0x296   :  { %v422_v54 = vpop.xlane.xlu0 %421  ;;  %v425_v55 = vpop.xlane.xlu1 %424 }
 0x297   :  { %1115 = vpow2.f32 %v433_v53  ;;  %v430_v56 = vsub.f32 %v413_v30, %v422_v54  ;;  %v431_v57 = vsub.f32 %v414_v34, %v425_v55 }
 0x299   :  { %v435_v58 = vmul.f32 1.442695, %v430_v56  ;;  %v437_v59 = vmul.f32 1.442695, %v431_v57 }
 0x29a   :  { %v428_v60 = vpop.xlane.xlu1 %427 }
 0x29b   :  { %1117 = vpow2.f32 %v435_v58  ;;  %v432_v61 = vsub.f32 %v415_v35, %v428_v60 }
 0x29c   :  { %1119 = vpow2.f32 %v437_v59 }
 0x29d   :  { %v439_v62 = vmul.f32 1.442695, %v432_v61 }
 0x29f   :  { %1121 = vpow2.f32 %v439_v62 }
 0x2a1   :  { %v1116_v63 = vpop.eup %1115  ;;  %v668_v1 = vpop.xlane.xlu1 %667 }
 0x2a2   :  { %v676_v2 = vsub.f32 %v660_v40, %v668_v1  ;;  %v665_v3 = vpop.xlane.xlu0 %664  ;;  %v441_v4 = vsel %vm416_vm1, %v1116_v63, 0.0 }
 0x2a3   :  { %v675_v5 = vsub.f32 %v659_v42, %v665_v3  ;;  %442 = vadd.xlane.f32.xlu0 %v441_v4 }
 0x2a4   :  { %v681_v6 = vmul.f32 1.442695, %v676_v2 }
 0x2a5   :  { %v1118_v8 = vpop.eup %1117  ;;  %v679_v9 = vmul.f32 1.442695, %v675_v5  ;;  %v674_v10 = vpop.xlane.xlu1 %673 }
 0x2a6   :  { %v1120_v0 = vpop.eup %1119  ;;  %1123 = vpow2.f32 %v681_v6  ;;  %v678_v12 = vsub.f32 %v662_v46, %v674_v10  ;;  %v671_v14 = vpop.xlane.xlu0 %670  ;;  %v444_v16 = vsel %vm416_vm1, %v1118_v8, 0.0 }
 0x2a7   :  { %1125 = vpow2.f32 %v679_v9  ;;  %v677_v18 = vsub.f32 %v661_v48, %v671_v14  ;;  %445 = vadd.xlane.f32.xlu1 %v444_v16  ;;  %v447_v19 = vsel %vm416_vm1, %v1120_v0, 0.0 }
 0x2a8   :  { %v685_v21 = vmul.f32 1.442695, %v678_v12  ;;  %448 = vadd.xlane.f32.xlu0 %v447_v19 }
 0x2a9   :  { %v1122_v22 = vpop.eup %1121  ;;  %v683_v23 = vmul.f32 1.442695, %v677_v18 }
 0x2aa   :  { %1127 = vpow2.f32 %v685_v21  ;;  %v450_v24 = vsel %vm416_vm1, %v1122_v22, 0.0 }
 0x2ab   :  { %1129 = vpow2.f32 %v683_v23  ;;  %451 = vadd.xlane.f32.xlu1 %v450_v24 }
 0x2b0   :  { %v1124_v25 = vpop.eup %1123 }
 0x2b1   :  { %v1126_v26 = vpop.eup %1125  ;;  %v690_v27 = vsel %vm416_vm1, %v1124_v25, 0.0 }
 0x2b2   :  { %691 = vadd.xlane.f32.xlu1 %v690_v27  ;;  %v687_v28 = vsel %vm416_vm1, %v1126_v26, 0.0 }
 0x2b3   :  { %688 = vadd.xlane.f32.xlu0 %v687_v28 }
 0x2b4   :  { %v1128_v29 = vpop.eup %1127 }
 0x2b5   :  { %v1130_v30 = vpop.eup %1129  ;;  %v696_v31 = vsel %vm416_vm1, %v1128_v29, 0.0 }
 0x2b6   :  { %697 = vadd.xlane.f32.xlu1 %v696_v31  ;;  %v693_v32 = vsel %vm416_vm1, %v1130_v30, 0.0 }
 0x2b7   :  { %694 = vadd.xlane.f32.xlu0 %v693_v32 }
 0x330   :  { %v443_v33 = vpop.xlane.xlu0 %442 }
 0x331   :  { %1131 = vrcp.f32 %v443_v33 }
 0x334   :  { %v446_v34 = vpop.xlane.xlu1 %445 }
 0x335   :  { %1133 = vrcp.f32 %v446_v34  ;;  %v449_v35 = vpop.xlane.xlu0 %448 }
 0x336   :  { %1135 = vrcp.f32 %v449_v35 }
 0x338   :  { %v452_v36 = vpop.xlane.xlu1 %451 }
 0x339   :  { %1137 = vrcp.f32 %v452_v36 }
 0x33b   :  { %v1132_v37 = vpop.eup %1131 }
 0x33c   :  { %v457_v41 = vmul.f32 %v1132_v37, %v1116_v63 }
 0x33f   :  { %v1134_v38 = vpop.eup %1133  ;;  %v692_v39 = vpop.xlane.xlu1 %691 }
 0x340   :  { %1139 = vrcp.f32 %v692_v39  ;;  %v689_v40 = vpop.xlane.xlu0 %688  ;;  %v458_v42 = vmul.f32 %v1134_v38, %v1118_v8  ;;  %v1136_v43 = vpop.eup %1135 }
 0x341   :  { %1141 = vrcp.f32 %v689_v40  ;;  %v459_v49 = vmul.f32 %v1136_v43, %v1120_v0 }
 0x342   :  { %v1071_v45 = vpack.c.bf16 %v458_v42, %v457_v41 }
 0x343   :  { %v1138_v46 = vpop.eup %1137  ;;  %v698_v47 = vpop.xlane.xlu1 %697 }
 0x344   :  { %1143 = vrcp.f32 %v698_v47  ;;  %1073 = vmatprep.subr.msk.bf16.mxu0 %vm1325_vm2, %v1071_v45  ;;  %v695_v48 = vpop.xlane.xlu0 %694  ;;  %v460_v50 = vmul.f32 %v1138_v46, %v1122_v22 }
 0x345   :  { %1145 = vrcp.f32 %v695_v48  ;;  %1076 = vmatpush3.bf16.xpose.msk.msra.mxu0 %vm1325_vm2, %v1071_v45 }
 0x346   :  { %v1077_v51 = vpack.c.bf16 %v460_v50, %v459_v49 }
 0x348   :  { %1079 = vmatprep.subr.msk.bf16.mxu0 %vm1325_vm2, %v1077_v51 }
 0x34a   :  { %v1140_v52 = vpop.eup %1139 }
 0x34b   :  { %v1142_v53 = vpop.eup %1141  ;;  %v704_v54 = vmul.f32 %v1140_v52, %v1124_v25 }
 0x34c   :  { %v703_v55 = vmul.f32 %v1142_v53, %v1126_v26 }
 0x34d   :  { %1082 = vmatpush3.bf16.xpose.msk.msra.mxu0 %vm1325_vm2, %v1077_v51 }
 0x34e   :  { %v1144_v56 = vpop.eup %1143  ;;  %v1091_v57 = vpack.c.bf16 %v704_v54, %v703_v55 }
 0x34f   :  { %v1146_v58 = vpop.eup %1145  ;;  %v706_v59 = vmul.f32 %v1144_v56, %v1128_v29 }
 0x350   :  { %1093 = vmatprep.subr.msk.bf16.mxu0 %vm1325_vm2, %v1091_v57  ;;  %1103 = vmatprep.subr.msk.bf16.mxu1 %vm1325_vm2, %v1091_v57  ;;  %v705_v60 = vmul.f32 %v1146_v58, %v1130_v30 }
 0x351   :  { %1105 = vmatpush3.bf16.xpose.msk.msra.mxu1 %vm1325_vm2, %v1091_v57 }
 0x352   :  { %v1097_v61 = vpack.c.bf16 %v706_v59, %v705_v60 }
 0x354   :  { %982 = vmatmul.mubr.msk.f32.vlgmr.msra.gmra.mrb[16].mxu0 %vm416_vm1, %v1293_v7  ;;  %1104 = vmatprep.subr.msk.bf16.mxu1 %vm1325_vm2, %v1097_v61 }
 0x355   :  { %984 = vmatprep.mubr.msk.f32.mxu0 %vm416_vm1, %v1298_v13  ;;  %1096 = vmatpush3.bf16.xpose.msk.msra.mxu0 %vm1325_vm2, %v1091_v57 }
 0x356   :  { %1099 = vmatprep.subr.msk.bf16.mxu0 %vm1325_vm2, %v1097_v61 }
 0x358   :  { %985 = vmatmul.mubr.msk.f32.gmra.mrb[18].mxu0 %vm416_vm1, %v1296_v11 }
 0x359   :  { %1106 = vmatpush3.bf16.xpose.msk.msra.mxu1 %vm1325_vm2, %v1097_v61  ;;  %1009 = vmatprep.mubr.msk.f32.mxu0 %vm416_vm1, %v1302_v17 }
 0x35d   :  { %1102 = vmatpush3.bf16.xpose.msk.msra.mxu0 %vm1325_vm2, %v1097_v61 }
 0x360   :  { %1013 = vmatmul.mubr.msk.f32.vlgmr.msra.gmra.mrb[16].mxu1 %vm416_vm1, %v1304_v20 }
 0x364   :  { %1010 = vmatmul.mubr.msk.f32.vlgmr.msra.gmra.mrb[20].mxu0 %vm416_vm1, %v1300_v15 }
 0x427   :  { %v983_v7 = vpop.f32.mrb[16].mxu0 }
 0x428   :  { %571 = vst.msk [vmem:[#allocation7 + $0x8] sm:$0xff] %vm416_vm1, %v983_v7  ;;  %v551_v13 = vpop.f32.mrb[17].mxu0 }
 0x429   :  { %570 = vst.msk [vmem:[#allocation7] sm:$0xff] %vm416_vm1, %v551_v13 }
 0x42b   :  { %v986_v11 = vpop.f32.mrb[18].mxu0 }
 0x42c   :  { %573 = vst.msk [vmem:[#allocation7 + $0x18] sm:$0xff] %vm416_vm1, %v986_v11  ;;  %v561_v62 = vpop.f32.mrb[19].mxu0 }
 0x42d   :  { %572 = vst.msk [vmem:[#allocation7 + $0x10] sm:$0xff] %vm416_vm1, %v561_v62 }
 0x433   :  { %v1014_v17 = vpop.f32.mrb[16].mxu1 }
 0x434   :  { %820 = vst.msk [vmem:[#allocation7 + $0x38] sm:$0xff] %vm416_vm1, %v1014_v17  ;;  %v807_v63 = vpop.f32.mrb[17].mxu1 }
 0x435   :  { %819 = vst.msk [vmem:[#allocation7 + $0x30] sm:$0xff] %vm416_vm1, %v807_v63 }
 0x437   :  { %v1011_v15 = vpop.f32.mrb[20].mxu0 }
 0x438   :  { %818 = vst.msk [vmem:[#allocation7 + $0x28] sm:$0xff] %vm416_vm1, %v1011_v15  ;;  %v797_v20 = vpop.f32.mrb[21].mxu0 }
 0x439   :  { %817 = vst.msk [vmem:[#allocation7 + $0x20] sm:$0xff] %vm416_vm1, %v797_v20 }
 0x43a   :  { %1202 = shalt.err (!%p1199_p6)
}
 0x43b   :  { %s1203_s12 = scalar_lea.hbm %s1390_s2, 1024 }
 0x43c   :  { %p1204_p7 = scmp.ne.s32.totalorder %s1390_s2, %s1203_s12  ;;  %p1207_p8 = scmp.lt.u32.totalorder %s1203_s12, %s1390_s2 }
 0x43e   :  { %p1209_p9 = pnand %p1207_p8, %p1204_p7 }
 0x440   :  { %1212 = shalt.err (!%p1209_p9)
}
 0x441   :  { %832 = dma.vmem_to_hbm [thread:$0]  %s827_s8, 1024, %s1390_s2, [#allocation4], %s1220_s19, %s1220_s19, %s1221_s20  }
 0x442   :  { %1217 = dma.done.wait [#allocation4], 1024  }
 0x443   :  { %1218 = vsyncadd [#allocation4], 4294966272 }
 0x444   :  { %836 = vsyncpa [#allocation3], 1 }
 0x445   :  { %837 = vsyncpa [#allocation6], 1 }
 0x446   :  { %838 = vsyncpa [#allocation4], 1 }

</bundles_post_ra>
